<compile_context>
chip_gen: v6e
topology: v6e:2x2x1
jax: 0.10.0
libtpu: 0.0.40
codegen_flags: <defaults>
</compile_context>

<pallas_src>
import numpy as np

import jax
import jax.numpy as jnp
from jax.experimental import pallas as pl
from jax.experimental.pallas import tpu as pltpu

LANES = 128
SUBLANES = 8


def _round_up(x, m):
    return ((x + m - 1) // m) * m


def _sa_rows_kernel(true_ref, pred_ref, re_ref, l1_ref):
    """Per-row masked cosine similarity + masked L1 for one (br, Dpad) block."""
    t = true_ref[...].astype(jnp.float32)
    p = pred_ref[...].astype(jnp.float32)

    mask = (t >= 0.0).astype(jnp.float32)          # true_mask
    pm = p * mask                                  # pred * true_mask
    tm = t * mask                                  # true * true_mask

    # torch: torch.abs(pred).sum(1)
    l1_ref[...] = jnp.sum(jnp.abs(pm), axis=-1, keepdims=True)

    # F.normalize semantics: x / max(||x||_2, 1e-12)
    pn = jnp.maximum(jnp.sqrt(jnp.sum(pm * pm, axis=-1, keepdims=True)), 1e-12)
    tn = jnp.maximum(jnp.sqrt(jnp.sum(tm * tm, axis=-1, keepdims=True)), 1e-12)
    dot = jnp.sum(pm * tm, axis=-1, keepdims=True)

    re = dot / (pn * tn)
    re = jnp.minimum(jnp.maximum(re, -1.0), 1.0)   # re[re>1]=1 ; re[re<-1]=-1
    re_ref[...] = re


def finetune_sa_loss_noneg(true, pred, label, *, l1_lambda=0.0, block_rows=512):
    """Pallas implementation of FinetuneSALossNoneg.forward (pearson=False)."""
    assert true.ndim == 2 and true.shape == pred.shape
    B, D = true.shape
    assert label.shape == (B,)

    d_pad = _round_up(D, LANES)

    # Clamp row-block: big enough to amortize per-step overhead (~0.35us),
    # small enough that 2 inputs x 2 buffers x tile stays ~<= 8 MiB on every
    # generation (v5e 16 MiB scoped default, v7x 64 MiB physical VMEM).
    vmem_budget = 8 * 1024 * 1024
    max_br_vmem = vmem_budget // (2 * 2 * d_pad * 4)
    max_br_vmem = max(SUBLANES, (max_br_vmem // SUBLANES) * SUBLANES)
    br = min(block_rows, max_br_vmem, _round_up(B, SUBLANES))
    br = max(SUBLANES, (br // SUBLANES) * SUBLANES)

    r_pad = _round_up(B, br)
    grid = (r_pad // br,)

    t2 = jnp.pad(true, ((0, r_pad - B), (0, d_pad - D)))
    p2 = jnp.pad(pred, ((0, r_pad - B), (0, d_pad - D)))

    re_rows, l1_rows = pl.pallas_call(
        _sa_rows_kernel,
        out_shape=(
            jax.ShapeDtypeStruct((r_pad, 1), jnp.float32),
            jax.ShapeDtypeStruct((r_pad, 1), jnp.float32),
        ),
        grid_spec=pltpu.PrefetchScalarGridSpec(
            num_scalar_prefetch=0,
            grid=grid,
            in_specs=[
                pl.BlockSpec((br, d_pad), lambda i: (i, 0)),
                pl.BlockSpec((br, d_pad), lambda i: (i, 0)),
            ],
            out_specs=[
                pl.BlockSpec((br, 1), lambda i: (i, 0)),
                pl.BlockSpec((br, 1), lambda i: (i, 0)),
            ],
        ),
        compiler_params=pltpu.CompilerParams(
            dimension_semantics=("parallel",),
        ),
    )(t2, p2)

    # Tiny O(B) epilogue in plain JAX.
    # TODO(synk): arccos (inverse trig) has no Mosaic lowering, so the per-row
    # spectral angle + masked means are finished here instead of in-kernel.
    label_f = label.astype(jnp.float32)
    valid = label_f > 0.0                          # filter_negs(label > 0)
    cnt = jnp.sum(valid.astype(jnp.float32))       # 0 kept rows -> NaN (matches torch)
    sas = 1.0 - (2.0 / jnp.pi) * jnp.arccos(re_rows[:B, 0])
    base = jnp.sum(jnp.where(valid, (sas - label_f) ** 2, 0.0)) / cnt
    l1_v = jnp.sum(jnp.where(valid, l1_rows[:B, 0], 0.0)) / cnt
    return base + l1_lambda * l1_v, base, l1_v


def _reference(true, pred, label, l1_lambda=0.0):
    """Faithful NumPy port of the PyTorch forward (spectral-angle path)."""
    true = np.asarray(true, np.float32)
    pred = np.asarray(pred, np.float32)
    label = np.asarray(label, np.float32)

    keep = label > 0
    t, p, lab = true[keep], pred[keep], label[keep]

    mask = (t >= 0).astype(np.float32)
    p = p * mask
    l1_v = np.abs(p).sum(1).mean()

    pm = p * mask
    tm = t * mask

    def l2norm(x):
        n = np.sqrt((x * x).sum(1, keepdims=True))
        return x / np.maximum(n, 1e-12)

    re = (l2norm(pm) * l2norm(tm)).sum(-1)
    re = np.clip(re, -1.0, 1.0)
    sas = 1.0 - 2.0 / np.pi * np.arccos(re)
    base = np.mean((sas - lab) ** 2)
    return base + l1_lambda * l1_v, base, l1_v


if __name__ == "__main__":
    key = jax.random.PRNGKey(0)
    k1, k2, k3 = jax.random.split(key, 3)

    # true/pred: [batch, n_ions] intensity-like tensors; label: [batch] SA targets.
    B, D = 64, 174
    true = jax.random.uniform(k1, (B, D), jnp.float32, minval=-0.2, maxval=1.0)
    pred = jax.random.normal(k2, (B, D), dtype=jnp.float32)
    label = jax.random.uniform(k3, (B,), jnp.float32, minval=-0.3, maxval=1.0)
    label = label.at[0].set(0.5)   # guarantee at least one kept row

    l1_lambda = 0.0001
    loss, base, l1_v = finetune_sa_loss_noneg(true, pred, label, l1_lambda=l1_lambda)
    loss = jax.block_until_ready(loss)
    base = jax.block_until_ready(base)
    l1_v = jax.block_until_ready(l1_v)

    ref_loss, ref_base, ref_l1 = _reference(true, pred, label, l1_lambda=l1_lambda)

    assert jnp.allclose(loss, ref_loss, rtol=1e-4, atol=1e-5), (loss, ref_loss)
    assert jnp.allclose(base, ref_base, rtol=1e-4, atol=1e-5), (base, ref_base)
    assert jnp.allclose(l1_v, ref_l1, rtol=1e-4, atol=1e-5), (l1_v, ref_l1)

    print("KERNEL_OK")
</pallas_src>

<mosaic_0001>
module attributes {stable_mosaic.version = 11 : i64} {
  func.func @_sa_rows_kernel(%arg0: i32, %arg1: memref<64x256xf32, #tpu.memory_space<vmem>>, %arg2: memref<64x256xf32, #tpu.memory_space<vmem>>, %arg3: memref<64x1xf32, #tpu.memory_space<vmem>>, %arg4: memref<64x1xf32, #tpu.memory_space<vmem>>) attributes {dimension_semantics = [#tpu.dimension_semantics<parallel>], iteration_bounds = array<i64: 1>, scalar_prefetch = 0 : i64, scratch_operands = 0 : i64, tpu.core_type = #tpu.core_type<tc>, window_params = [{transform_indices = @transform_0, window_bounds = array<i64: 64, 256>}, {transform_indices = @transform_1, window_bounds = array<i64: 64, 256>}, {transform_indices = @transform_2, window_bounds = array<i64: 64, 1>}, {transform_indices = @transform_3, window_bounds = array<i64: 64, 1>}]} {
    %c0 = arith.constant 0 : index
    %c0_0 = arith.constant 0 : index
    %0 = vector.load %arg1[%c0, %c0_0] : memref<64x256xf32, #tpu.memory_space<vmem>>, vector<64x256xf32>
    %c0_1 = arith.constant 0 : index
    %c0_2 = arith.constant 0 : index
    %1 = vector.load %arg2[%c0_1, %c0_2] : memref<64x256xf32, #tpu.memory_space<vmem>>, vector<64x256xf32>
    %cst = arith.constant 0.000000e+00 : f32
    %2 = vector.broadcast %cst : f32 to vector<64x256xf32>
    %3 = arith.cmpf oge, %0, %2 : vector<64x256xf32>
    %4 = arith.extui %3 : vector<64x256xi1> to vector<64x256xi32>
    %5 = arith.sitofp %4 : vector<64x256xi32> to vector<64x256xf32>
    %6 = arith.mulf %1, %5 : vector<64x256xf32>
    %7 = arith.mulf %0, %5 : vector<64x256xf32>
    %8 = math.absf %6 : vector<64x256xf32>
    %cst_3 = arith.constant dense<0.000000e+00> : vector<64xf32>
    %9 = vector.multi_reduction <add>, %8, %cst_3 [1] : vector<64x256xf32> to vector<64xf32>
    %10 = vector.shape_cast %9 : vector<64xf32> to vector<64x1xf32>
    %c0_4 = arith.constant 0 : index
    %c0_5 = arith.constant 0 : index
    %11 = vector.load %arg4[%c0_4, %c0_5] : memref<64x1xf32, #tpu.memory_space<vmem>>, vector<64x1xf32>
    tpu.vector_store %arg4[%c0_4, %c0_5], %10 {strides = array<i32>} : memref<64x1xf32, #tpu.memory_space<vmem>>, vector<64x1xf32>,
    %12 = arith.mulf %6, %6 : vector<64x256xf32>
    %cst_6 = arith.constant dense<0.000000e+00> : vector<64xf32>
    %13 = vector.multi_reduction <add>, %12, %cst_6 [1] : vector<64x256xf32> to vector<64xf32>
    %14 = vector.shape_cast %13 : vector<64xf32> to vector<64x1xf32>
    %15 = math.sqrt %14 : vector<64x1xf32>
    %cst_7 = arith.constant 9.99999996E-13 : f32
    %16 = vector.broadcast %cst_7 : f32 to vector<64x1xf32>
    %17 = arith.maximumf %15, %16 : vector<64x1xf32>
    %18 = arith.mulf %7, %7 : vector<64x256xf32>
    %cst_8 = arith.constant dense<0.000000e+00> : vector<64xf32>
    %19 = vector.multi_reduction <add>, %18, %cst_8 [1] : vector<64x256xf32> to vector<64xf32>
    %20 = vector.shape_cast %19 : vector<64xf32> to vector<64x1xf32>
    %21 = math.sqrt %20 : vector<64x1xf32>
    %cst_9 = arith.constant 9.99999996E-13 : f32
    %22 = vector.broadcast %cst_9 : f32 to vector<64x1xf32>
    %23 = arith.maximumf %21, %22 : vector<64x1xf32>
    %24 = arith.mulf %6, %7 : vector<64x256xf32>
    %cst_10 = arith.constant dense<0.000000e+00> : vector<64xf32>
    %25 = vector.multi_reduction <add>, %24, %cst_10 [1] : vector<64x256xf32> to vector<64xf32>
    %26 = vector.shape_cast %25 : vector<64xf32> to vector<64x1xf32>
    %27 = arith.mulf %17, %23 : vector<64x1xf32>
    %28 = arith.divf %26, %27 : vector<64x1xf32>
    %cst_11 = arith.constant -1.000000e+00 : f32
    %29 = vector.broadcast %cst_11 : f32 to vector<64x1xf32>
    %30 = arith.maximumf %28, %29 : vector<64x1xf32>
    %cst_12 = arith.constant 1.000000e+00 : f32
    %31 = vector.broadcast %cst_12 : f32 to vector<64x1xf32>
    %32 = arith.minimumf %30, %31 : vector<64x1xf32>
    %c0_13 = arith.constant 0 : index
    %c0_14 = arith.constant 0 : index
    %33 = vector.load %arg3[%c0_13, %c0_14] : memref<64x1xf32, #tpu.memory_space<vmem>>, vector<64x1xf32>
    tpu.vector_store %arg3[%c0_13, %c0_14], %32 {strides = array<i32>} : memref<64x1xf32, #tpu.memory_space<vmem>>, vector<64x1xf32>,
    return
  }
  func.func @transform_0(%arg0: i32) -> (i32, i32) {
    %c0_i32 = arith.constant 0 : i32
    %c0_i32_0 = arith.constant 0 : i32
    return %arg0, %c0_i32 : i32, i32
  }
  func.func @transform_1(%arg0: i32) -> (i32, i32) {
    %c0_i32 = arith.constant 0 : i32
    %c0_i32_0 = arith.constant 0 : i32
    return %arg0, %c0_i32 : i32, i32
  }
  func.func @transform_2(%arg0: i32) -> (i32, i32) {
    %c0_i32 = arith.constant 0 : i32
    %c0_i32_0 = arith.constant 0 : i32
    return %arg0, %c0_i32 : i32, i32
  }
  func.func @transform_3(%arg0: i32) -> (i32, i32) {
    %c0_i32 = arith.constant 0 : i32
    %c0_i32_0 = arith.constant 0 : i32
    return %arg0, %c0_i32 : i32, i32
  }
}

</mosaic_0001>

<bundles_post_ra>
// kernel: tpu_custom_call.1
= control target key start
LH: loop header
LB: loop body
LE: loop exit
PB: predicated region body
PF: predicated region fallthrough
CT: control target
= control target key end

     0   :  { %9 = vsyncpa [#allocation3], 0  ;;  %s1141_s0 = inlined_call_operand.hbm [shape: f32[64,256], index: 0, kind: input, shape index: {}]   ;;  %s1142_s1 = inlined_call_operand.hbm [shape: f32[64,256], index: 1, kind: input, shape index: {}]   ;;  %s1143_s2 = inlined_call_operand.vmem [shape: f32[64,1], index: 2, kind: output, shape index: {0}]   ;;  %s1144_s3 = inlined_call_operand.vmem [shape: f32[64,1], index: 3, kind: output, shape index: {1}]  }
   0x1   :  { %10 = vsyncpa [#allocation5], 0  ;;  %s629_s12 = smov [#allocation2]  }
   0x2   :  { %s16_s13 = sshll.u32 %s629_s12, 4  ;;  %s17_s13 = int_to_ptr.vmem [resolvable:$true] %s16_s13 }
   0x3   :  { %s593_s14 = scalar_lea.vmem %s17_s13, 2048  ;;  %p598_p1 = scmp.lt.s32.totalorder %s17_s13, %s17_s13 }
   0x4   :  { %p594_p0 = scmp.ne.s32.totalorder %s17_s13, %s593_s14  ;;  %p599_p2 = scmp.lt.s32.totalorder %s593_s14, %s593_s14 }
   0x6   :  { %p600_p3 = por %p599_p2, %p598_p1 }
   0x8   :  { %p601_p4 = pnand %p600_p3, %p594_p0 }
   0xa   :  { %604 = shalt.err (!%p601_p4)
}
   0xb   :  { %s630_s15 = smov 256   ;;  %s631_s16 = smov 16  }
   0xc   :  { %22 = dma.hbm_to_vmem [thread:$0]  %s1141_s0, 2048, %s17_s13, [#allocation3], %s630_s15, %s630_s15, %s631_s16  }
   0xd   :  { %s632_s19 = smov [#allocation4]  }
   0xe   :  { %s28_s20 = sshll.u32 %s632_s19, 4  ;;  %s29_s20 = int_to_ptr.vmem [resolvable:$true] %s28_s20 }
   0xf   :  { %s613_s21 = scalar_lea.vmem %s29_s20, 2048  ;;  %p618_p6 = scmp.lt.s32.totalorder %s29_s20, %s29_s20 }
  0x10   :  { %p614_p5 = scmp.ne.s32.totalorder %s29_s20, %s613_s21  ;;  %p619_p7 = scmp.lt.s32.totalorder %s613_s21, %s613_s21 }
  0x12   :  { %p620_p8 = por %p619_p7, %p618_p6 }
  0x14   :  { %p621_p9 = pnand %p620_p8, %p614_p5 }
  0x16   :  { %624 = shalt.err (!%p621_p9)
}
  0x17   :  { %34 = dma.hbm_to_vmem [thread:$0]  %s1142_s1, 2048, %s29_s20, [#allocation5], %s630_s15, %s630_s15, %s631_s16  }
  0x18   :  { %625 = dma.done.wait [#allocation3], 2048  }
  0x19   :  { %626 = vsyncadd [#allocation3], 4294965248 }
  0x1a   :  { %627 = dma.done.wait [#allocation5], 2048  }
  0x1b   :  { %628 = vsyncadd [#allocation5], 4294965248  ;;  %v660_v0 = vld [vmem:[#allocation2 + $0x20] sm:$0xff]  ;;  %v662_v1 = vld [vmem:[#allocation2 + $0x28] sm:$0xff]  ;;  %v633_v6 = vmov 0.0  }
  0x1c   :  { %v61_v2 = vld [vmem:[#allocation4 + $0x20] sm:$0xff]  ;;  %v62_v3 = vld [vmem:[#allocation4 + $0x28] sm:$0xff]  ;;  %vm77_vm0 = vcmp.ge.f32.partialorder %v660_v0, 0.0  ;;  %vm78_vm1 = vcmp.ge.f32.partialorder %v662_v1, 0.0  ;;  %v690_v15 = vld [vmem:[#allocation2 + $0x30] sm:$0xff] }
  0x1d   :  { %v666_v4 = vld [vmem:[#allocation2] sm:$0xff]  ;;  %v668_v5 = vld [vmem:[#allocation2 + $0x8] sm:$0xff]  ;;  %v671_v7 = vsel %vm77_vm0, 1.0, %v633_v6  ;;  %v674_v8 = vsel %vm78_vm1, 1.0, %v633_v6  ;;  %v692_v16 = vld [vmem:[#allocation2 + $0x38] sm:$0xff]  ;;  %vm79_vm4 = vcmp.ge.f32.partialorder %v690_v15, 0.0 }
  0x1e   :  { %v57_v9 = vld [vmem:[#allocation4] sm:$0xff]  ;;  %v58_v10 = vld [vmem:[#allocation4 + $0x8] sm:$0xff]  ;;  %vm73_vm2 = vcmp.ge.f32.partialorder %v666_v4, 0.0  ;;  %vm74_vm3 = vcmp.ge.f32.partialorder %v668_v5, 0.0  ;;  %v679_v11 = vmul.f32 %v671_v7, %v61_v2  ;;  %v682_v12 = vmul.f32 %v674_v8, %v62_v3  ;;  %v63_v17 = vld [vmem:[#allocation4 + $0x30] sm:$0xff] }
  0x1f   :  { %v685_v13 = vsel %vm73_vm2, 1.0, %v633_v6  ;;  %v688_v14 = vsel %vm74_vm3, 1.0, %v633_v6  ;;  %v64_v20 = vld [vmem:[#allocation4 + $0x38] sm:$0xff]  ;;  %vm80_vm5 = vcmp.ge.f32.partialorder %v692_v16, 0.0  ;;  %v702_v21 = vld [vmem:[#allocation2 + $0x10] sm:$0xff]  ;;  %v711_v25 = vsel %vm79_vm4, 1.0, %v633_v6 }
  0x20   :  { %v695_v18 = vmul.f32 %v685_v13, %v57_v9  ;;  %v698_v19 = vmul.f32 %v688_v14, %v58_v10  ;;  %v704_v22 = vld [vmem:[#allocation2 + $0x18] sm:$0xff]  ;;  %v206_v23 = vmul.f32 %v679_v11, %v679_v11  ;;  %v207_v24 = vmul.f32 %v682_v12, %v682_v12  ;;  %v716_v27 = vld [vmem:[#allocation2 + $0x50] sm:$0xff]  ;;  %v738_v42 = vld [vmem:[#allocation2 + $0x40] sm:$0xff] }
  0x21   :  { %v714_v26 = vsel %vm80_vm5, 1.0, %v633_v6  ;;  %v723_v30 = vmul.f32 %v711_v25, %v63_v17  ;;  %v59_v32 = vld [vmem:[#allocation4 + $0x10] sm:$0xff]  ;;  %v728_v33 = vld [vmem:[#allocation2 + $0x58] sm:$0xff]  ;;  %vm75_vm6 = vcmp.ge.f32.partialorder %v702_v21, 0.0  ;;  %vm76_vm7 = vcmp.ge.f32.partialorder %v704_v22, 0.0  ;;  %v740_v43 = vld [vmem:[#allocation2 + $0x48] sm:$0xff] }
  0x22   :  { %v202_v28 = vmul.f32 %v695_v18, %v695_v18  ;;  %v203_v29 = vmul.f32 %v698_v19, %v698_v19  ;;  %v726_v31 = vmul.f32 %v714_v26, %v64_v20  ;;  %v224_v34 = vadd.f32 %v207_v24, %v206_v23  ;;  %v60_v35 = vld [vmem:[#allocation4 + $0x18] sm:$0xff]  ;;  %v67_v36 = vld [vmem:[#allocation4 + $0x50] sm:$0xff]  ;;  %v65_v51 = vld [vmem:[#allocation4 + $0x40] sm:$0xff] }
  0x23   :  { %vm83_vm8 = vcmp.ge.f32.partialorder %v716_v27, 0.0  ;;  %v208_v38 = vmul.f32 %v723_v30, %v723_v30  ;;  %v510_v40 = vsel %vm75_vm6, 1.0, %v633_v6  ;;  %v68_v41 = vld [vmem:[#allocation4 + $0x58] sm:$0xff]  ;;  %v511_v44 = vsel %vm76_vm7, 1.0, %v633_v6  ;;  %v66_v52 = vld [vmem:[#allocation4 + $0x48] sm:$0xff]  ;;  %v757_v53 = vld [vmem:[#allocation2 + $0x70] sm:$0xff] }
  0x24   :  { %v218_v37 = vadd.f32 %v203_v29, %v202_v28  ;;  %v209_v39 = vmul.f32 %v726_v31, %v726_v31  ;;  %225 = vadd.xlane.f32.xlu1 %v224_v34  ;;  %v743_v45 = vmul.f32 %v510_v40, %v59_v32  ;;  %vm84_vm9 = vcmp.ge.f32.partialorder %v728_v33, 0.0  ;;  %v766_v56 = vld [vmem:[#allocation2 + $0x78] sm:$0xff]  ;;  %v768_v57 = vld [vmem:[#allocation2 + $0x60] sm:$0xff]  ;;  %v71_v3 = vld [vmem:[#allocation4 + $0x70] sm:$0xff] }
  0x25   :  { %v747_v46 = vsel %vm83_vm8, 1.0, %v633_v6  ;;  %v749_v48 = vmul.f32 %v511_v44, %v60_v35  ;;  %v752_v49 = vsel %vm84_vm9, 1.0, %v633_v6  ;;  %vm81_vm10 = vcmp.ge.f32.partialorder %v738_v42, 0.0  ;;  %v72_v9 = vld [vmem:[#allocation4 + $0x78] sm:$0xff]  ;;  %v783_v10 = vld [vmem:[#allocation2 + $0x68] sm:$0xff]  ;;  %v69_v23 = vld [vmem:[#allocation4 + $0x60] sm:$0xff] }
  0x26   :  { %219 = vadd.xlane.f32.xlu0 %v218_v37  ;;  %v227_v47 = vadd.f32 %v209_v39, %v208_v38  ;;  %v755_v50 = vmul.f32 %v747_v46, %v67_v36  ;;  %v204_v54 = vmul.f32 %v743_v45, %v743_v45  ;;  %v762_v55 = vmul.f32 %v752_v49, %v68_v41  ;;  %v70_v34 = vld [vmem:[#allocation4 + $0x68] sm:$0xff] }
  0x27   :  { %vm82_vm11 = vcmp.ge.f32.partialorder %v740_v43, 0.0  ;;  %v205_v58 = vmul.f32 %v749_v48, %v749_v48  ;;  %v516_v60 = vsel %vm81_vm10, 1.0, %v633_v6  ;;  %vm87_vm12 = vcmp.ge.f32.partialorder %v757_v53, 0.0 }
  0x28   :  { %v212_v59 = vmul.f32 %v755_v50, %v755_v50  ;;  %v517_v61 = vsel %vm82_vm11, 1.0, %v633_v6  ;;  %228 = vadd.xlane.f32.xlu1 %v227_v47  ;;  %v213_v62 = vmul.f32 %v762_v55, %v762_v55  ;;  %v778_v63 = vmul.f32 %v516_v60, %v65_v51 }
  0x29   :  { %v780_v2 = vmul.f32 %v517_v61, %v66_v52  ;;  %v221_v17 = vadd.f32 %v205_v58, %v204_v54  ;;  %vm88_vm13 = vcmp.ge.f32.partialorder %v766_v56, 0.0  ;;  %v522_v20 = vsel %vm87_vm12, 1.0, %v633_v6 }
  0x2a   :  { %vm85_vm14 = vcmp.ge.f32.partialorder %v768_v57, 0.0  ;;  %v233_v24 = vadd.f32 %v213_v62, %v212_v59  ;;  %v210_v28 = vmul.f32 %v778_v63, %v778_v63  ;;  %v523_v32 = vsel %vm88_vm13, 1.0, %v633_v6 }
  0x2b   :  { %v211_v29 = vmul.f32 %v780_v2, %v780_v2  ;;  %222 = vadd.xlane.f32.xlu0 %v221_v17  ;;  %v793_v35 = vmul.f32 %v522_v20, %v71_v3  ;;  %v795_v36 = vmul.f32 %v523_v32, %v72_v9  ;;  %vm86_vm15 = vcmp.ge.f32.partialorder %v783_v10, 0.0 }
  0x2c   :  { %v520_v37 = vsel %vm85_vm14, 1.0, %v633_v6  ;;  %234 = vadd.xlane.f32.xlu1 %v233_v24  ;;  %v521_v39 = vsel %vm86_vm15, 1.0, %v633_v6  ;;  %v139_v47 = vmul.f32 %v510_v40, %v702_v21  ;;  %v140_v58 = vmul.f32 %v511_v44, %v704_v22 }
  0x2d   :  { %v230_v38 = vadd.f32 %v211_v29, %v210_v28  ;;  %v800_v41 = vmul.f32 %v520_v37, %v69_v23  ;;  %v216_v51 = vmul.f32 %v793_v35, %v793_v35  ;;  %v217_v52 = vmul.f32 %v795_v36, %v795_v36 }
  0x2e   :  { %v807_v54 = vmul.f32 %v521_v39, %v70_v34  ;;  %v308_v62 = vmul.f32 %v139_v47, %v139_v47  ;;  %v137_v6 = vmul.f32 %v685_v13, %v666_v4  ;;  %v138_v21 = vmul.f32 %v688_v14, %v668_v5 }
  0x2f   :  { %v214_v59 = vmul.f32 %v800_v41, %v800_v41  ;;  %231 = vadd.xlane.f32.xlu0 %v230_v38  ;;  %v239_v40 = vadd.f32 %v217_v52, %v216_v51  ;;  %v309_v9 = vmul.f32 %v140_v58, %v140_v58  ;;  %v143_v17 = vmul.f32 %v711_v25, %v690_v15 }
  0x30   :  { %v215_v3 = vmul.f32 %v807_v54, %v807_v54  ;;  %v306_v22 = vmul.f32 %v137_v6, %v137_v6  ;;  %v307_v44 = vmul.f32 %v138_v21, %v138_v21  ;;  %v144_v23 = vmul.f32 %v714_v26, %v692_v16 }
  0x31   :  { %v141_v4 = vmul.f32 %v671_v7, %v660_v0  ;;  %240 = vadd.xlane.f32.xlu1 %v239_v40  ;;  %v325_v5 = vadd.f32 %v309_v9, %v308_v62  ;;  %v312_v14 = vmul.f32 %v143_v17, %v143_v17  ;;  %v142_v24 = vmul.f32 %v674_v8, %v662_v1 }
  0x32   :  { %v236_v13 = vadd.f32 %v215_v3, %v214_v59  ;;  %v322_v28 = vadd.f32 %v307_v44, %v306_v22  ;;  %v313_v29 = vmul.f32 %v144_v23, %v144_v23  ;;  %v147_v15 = vmul.f32 %v747_v46, %v716_v27 }
  0x33   :  { %v310_v34 = vmul.f32 %v141_v4, %v141_v4  ;;  %v311_v25 = vmul.f32 %v142_v24, %v142_v24  ;;  %v148_v16 = vmul.f32 %v752_v49, %v728_v33  ;;  %v145_v0 = vmul.f32 %v516_v60, %v738_v42 }
  0x34   :  { %237 = vadd.xlane.f32.xlu0 %v236_v13  ;;  %v146_v7 = vmul.f32 %v517_v61, %v740_v43  ;;  %v331_v26 = vadd.f32 %v313_v29, %v312_v14  ;;  %v316_v38 = vmul.f32 %v147_v15, %v147_v15  ;;  %v151_v1 = vmul.f32 %v522_v20, %v757_v53 }
  0x35   :  { %326 = vadd.xlane.f32.xlu1 %v325_v5  ;;  %v317_v51 = vmul.f32 %v148_v16, %v148_v16  ;;  %v152_v8 = vmul.f32 %v523_v32, %v766_v56  ;;  %v328_v52 = vadd.f32 %v311_v25, %v310_v34  ;;  %v314_v27 = vmul.f32 %v145_v0, %v145_v0 }
  0x36   :  { %v315_v46 = vmul.f32 %v146_v7, %v146_v7  ;;  %v149_v59 = vmul.f32 %v520_v37, %v768_v57  ;;  %v150_v33 = vmul.f32 %v521_v39, %v783_v10  ;;  %v320_v49 = vmul.f32 %v151_v1, %v151_v1 }
  0x37   :  { %v337_v42 = vadd.f32 %v317_v51, %v316_v38  ;;  %v321_v43 = vmul.f32 %v152_v8, %v152_v8  ;;  %v412_v56 = vmul.f32 %v139_v47, %v743_v45  ;;  %v413_v20 = vmul.f32 %v140_v58, %v749_v48 }
  0x38   :  { %323 = vadd.xlane.f32.xlu0 %v322_v28  ;;  %v334_v60 = vadd.f32 %v315_v46, %v314_v27  ;;  %v318_v61 = vmul.f32 %v149_v59, %v149_v59  ;;  %v319_v62 = vmul.f32 %v150_v33, %v150_v33  ;;  %v410_v57 = vmul.f32 %v137_v6, %v695_v18 }
  0x39   :  { %332 = vadd.xlane.f32.xlu1 %v331_v26  ;;  %v343_v53 = vadd.f32 %v321_v43, %v320_v49  ;;  %v411_v10 = vmul.f32 %v138_v21, %v698_v19  ;;  %v429_v37 = vadd.f32 %v413_v20, %v412_v56  ;;  %v416_v39 = vmul.f32 %v143_v17, %v723_v30 }
  0x3a   :  { %v340_v32 = vadd.f32 %v319_v62, %v318_v61  ;;  %v417_v40 = vmul.f32 %v144_v23, %v726_v31  ;;  %v414_v9 = vmul.f32 %v141_v4, %v679_v11  ;;  %v415_v47 = vmul.f32 %v142_v24, %v682_v12 }
  0x3b   :  { %v426_v3 = vadd.f32 %v411_v10, %v410_v57  ;;  %v420_v22 = vmul.f32 %v147_v15, %v755_v50  ;;  %v421_v6 = vmul.f32 %v148_v16, %v762_v55  ;;  %v418_v44 = vmul.f32 %v145_v0, %v778_v63 }
  0x3c   :  { %329 = vadd.xlane.f32.xlu0 %v328_v52  ;;  %v435_v58 = vadd.f32 %v417_v40, %v416_v39  ;;  %v432_v21 = vadd.f32 %v415_v47, %v414_v9  ;;  %v419_v17 = vmul.f32 %v146_v7, %v780_v2  ;;  %v424_v13 = vmul.f32 %v151_v1, %v793_v35 }
  0x3d   :  { %338 = vadd.xlane.f32.xlu1 %v337_v42  ;;  %v441_v23 = vadd.f32 %v421_v6, %v420_v22  ;;  %v425_v4 = vmul.f32 %v152_v8, %v795_v36  ;;  %v422_v14 = vmul.f32 %v149_v59, %v800_v41  ;;  %v423_v24 = vmul.f32 %v150_v33, %v807_v54 }
  0x3e   :  { %v438_v5 = vadd.f32 %v419_v17, %v418_v44  ;;  %v155_v29 = vand.u32 2147483647, %v743_v45  ;;  %v156_v34 = vand.u32 2147483647, %v749_v48  ;;  %v153_v25 = vand.u32 2147483647, %v695_v18 }
  0x3f   :  { %v447_v28 = vadd.f32 %v425_v4, %v424_v13  ;;  %v444_v15 = vadd.f32 %v423_v24, %v422_v14  ;;  %v154_v16 = vand.u32 2147483647, %v698_v19  ;;  %v159_v7 = vand.u32 2147483647, %v723_v30 }
  0x40   :  { %335 = vadd.xlane.f32.xlu0 %v334_v60  ;;  %v172_v0 = vadd.f32 %v156_v34, %v155_v29  ;;  %v160_v26 = vand.u32 2147483647, %v726_v31  ;;  %v157_v51 = vand.u32 2147483647, %v679_v11  ;;  %v158_v45 = vand.u32 2147483647, %v682_v12 }
  0x41   :  { %344 = vadd.xlane.f32.xlu1 %v343_v53  ;;  %v169_v38 = vadd.f32 %v154_v16, %v153_v25  ;;  %v163_v1 = vand.u32 2147483647, %v755_v50  ;;  %v164_v18 = vand.u32 2147483647, %v762_v55  ;;  %v161_v8 = vand.u32 2147483647, %v778_v63 }
  0x42   :  { %v178_v48 = vadd.f32 %v160_v26, %v159_v7  ;;  %v175_v19 = vadd.f32 %v158_v45, %v157_v51  ;;  %v162_v30 = vand.u32 2147483647, %v780_v2  ;;  %v167_v52 = vand.u32 2147483647, %v793_v35 }
  0x43   :  { %v184_v31 = vadd.f32 %v164_v18, %v163_v1  ;;  %v168_v11 = vand.u32 2147483647, %v795_v36  ;;  %v165_v27 = vand.u32 2147483647, %v800_v41  ;;  %v166_v50 = vand.u32 2147483647, %v807_v54 }
  0x44   :  { %341 = vadd.xlane.f32.xlu0 %v340_v32  ;;  %v181_v12 = vadd.f32 %v162_v30, %v161_v8 }
  0x45   :  { %430 = vadd.xlane.f32.xlu1 %v429_v37  ;;  %v190_v55 = vadd.f32 %v168_v11, %v167_v52  ;;  %v187_v46 = vadd.f32 %v166_v50, %v165_v27 }
  0x48   :  { %427 = vadd.xlane.f32.xlu0 %v426_v3 }
  0x49   :  { %436 = vadd.xlane.f32.xlu1 %v435_v58 }
  0x4c   :  { %433 = vadd.xlane.f32.xlu0 %v432_v21 }
  0x4d   :  { %442 = vadd.xlane.f32.xlu1 %v441_v23 }
  0x50   :  { %439 = vadd.xlane.f32.xlu0 %v438_v5 }
  0x51   :  { %448 = vadd.xlane.f32.xlu1 %v447_v28 }
  0x54   :  { %445 = vadd.xlane.f32.xlu0 %v444_v15 }
  0x55   :  { %173 = vadd.xlane.f32.xlu1 %v172_v0 }
  0x58   :  { %170 = vadd.xlane.f32.xlu0 %v169_v38 }
  0x59   :  { %179 = vadd.xlane.f32.xlu1 %v178_v48 }
  0x5c   :  { %176 = vadd.xlane.f32.xlu0 %v175_v19 }
  0x5d   :  { %185 = vadd.xlane.f32.xlu1 %v184_v31 }
  0x60   :  { %182 = vadd.xlane.f32.xlu0 %v181_v12 }
  0x61   :  { %191 = vadd.xlane.f32.xlu1 %v190_v55 }
  0x64   :  { %188 = vadd.xlane.f32.xlu0 %v187_v46 }
  0xad   :  { %v226_v63 = vpop.xlane.xlu1 %225 }
  0xae   :  { %537 = vrsqrt.f32 %v226_v63  ;;  %vm258_vm0 = vcmp.eq.f32.partialorder %v226_v63, inf  ;;  %vm260_vm1 = vcmp.eq.f32.partialorder %v226_v63, 0.0  ;;  %v261_v53 = vand.u32 2147483648, %v226_v63 }
  0xaf   :  { %v220_v2 = vpop.xlane.xlu0 %219 }
  0xb0   :  { %539 = vrsqrt.f32 %v220_v2  ;;  %vm244_vm2 = vcmp.eq.f32.partialorder %v220_v2, inf  ;;  %vm246_vm3 = vcmp.eq.f32.partialorder %v220_v2, 0.0  ;;  %v247_v20 = vand.u32 2147483648, %v220_v2 }
  0xb1   :  { %v868_v59 = vpop.xlane.xlu1 %228 }
  0xb2   :  { %541 = vrsqrt.f32 %v868_v59  ;;  %vm265_vm4 = vcmp.eq.f32.partialorder %v868_v59, inf  ;;  %vm267_vm5 = vcmp.eq.f32.partialorder %v868_v59, 0.0  ;;  %v268_v37 = vand.u32 2147483648, %v868_v59 }
  0xb4   :  { %v871_v35 = vpop.xlane.xlu0 %222 }
  0xb5   :  { %543 = vrsqrt.f32 %v871_v35  ;;  %v874_v36 = vpop.xlane.xlu1 %234  ;;  %vm251_vm6 = vcmp.eq.f32.partialorder %v871_v35, inf  ;;  %vm253_vm7 = vcmp.eq.f32.partialorder %v871_v35, 0.0  ;;  %v254_v47 = vand.u32 2147483648, %v871_v35 }
  0xb6   :  { %545 = vrsqrt.f32 %v874_v36  ;;  %vm279_vm8 = vcmp.eq.f32.partialorder %v874_v36, inf  ;;  %vm281_vm9 = vcmp.eq.f32.partialorder %v874_v36, 0.0  ;;  %v282_v21 = vand.u32 2147483648, %v874_v36 }
  0xb8   :  { %v877_v41 = vpop.xlane.xlu0 %231 }
  0xb9   :  { %547 = vrsqrt.f32 %v877_v41  ;;  %vm272_vm10 = vcmp.eq.f32.partialorder %v877_v41, inf  ;;  %v275_v13 = vand.u32 2147483648, %v877_v41  ;;  %vm274_vm11 = vcmp.eq.f32.partialorder %v877_v41, 0.0 }
  0xba   :  { %v880_v54 = vpop.xlane.xlu1 %240 }
  0xbb   :  { %v538_v33 = vpop.eup %537  ;;  %549 = vrsqrt.f32 %v880_v54  ;;  %v296_v5 = vand.u32 2147483648, %v880_v54  ;;  %vm293_vm13 = vcmp.eq.f32.partialorder %v880_v54, inf }
  0xbc   :  { %v257_v43 = vmul.f32 %v538_v33, %v226_v63 }
  0xbd   :  { %v540_v42 = vpop.eup %539  ;;  %v882_v49 = vpop.xlane.xlu0 %237 }
  0xbe   :  { %v885_v60 = vpop.xlane.xlu1 %326  ;;  %v243_v62 = vmul.f32 %v540_v42, %v220_v2  ;;  %v259_v57 = vsel %vm258_vm0, %v226_v63, %v257_v43  ;;  %v289_v14 = vand.u32 2147483648, %v882_v49 }
  0xbf   :  { %v542_v61 = vpop.eup %541  ;;  %551 = vrsqrt.f32 %v885_v60  ;;  %v908_v6 = vsel %vm260_vm1, %v261_v53, %v259_v57  ;;  %vm355_vm12 = vcmp.eq.f32.partialorder %v885_v60, inf  ;;  %vm357_vm14 = vcmp.eq.f32.partialorder %v885_v60, 0.0 }
  0xc0   :  { %v264_v10 = vmul.f32 %v542_v61, %v868_v59  ;;  %v245_v3 = vsel %vm244_vm2, %v220_v2, %v243_v62  ;;  %v300_v24 = vmax.f32 %v908_v6, 1e-12  ;;  %v358_v7 = vand.u32 2147483648, %v885_v60 }
  0xc1   :  { %v888_v56 = vpop.xlane.xlu0 %323  ;;  %v914_v17 = vsel %vm246_vm3, %v247_v20, %v245_v3  ;;  %vm295_vm1 = vcmp.eq.f32.partialorder %v880_v54, 0.0 }
  0xc2   :  { %553 = vrsqrt.f32 %v888_v56  ;;  %v544_v32 = vpop.eup %543  ;;  %v896_v39 = vpop.xlane.xlu1 %332  ;;  %v266_v23 = vsel %vm265_vm4, %v868_v59, %v264_v10  ;;  %v298_v15 = vmax.f32 %v914_v17, 1e-12  ;;  %vm348_vm15 = vcmp.eq.f32.partialorder %v888_v56, inf }
  0xc3   :  { %555 = vrsqrt.f32 %v882_v49  ;;  %v546_v40 = vpop.eup %545  ;;  %v250_v9 = vmul.f32 %v544_v32, %v871_v35  ;;  %v942_v25 = vsel %vm267_vm5, %v268_v37, %v266_v23  ;;  %vm350_vm0 = vcmp.eq.f32.partialorder %v888_v56, 0.0 }
  0xc4   :  { %557 = vrsqrt.f32 %v896_v39  ;;  %v278_v58 = vmul.f32 %v546_v40, %v874_v36  ;;  %v351_v26 = vand.u32 2147483648, %v888_v56  ;;  %vm369_vm2 = vcmp.eq.f32.partialorder %v896_v39, inf }
  0xc5   :  { %v905_v22 = vpop.xlane.xlu0 %329  ;;  %v252_v28 = vsel %vm251_vm6, %v871_v35, %v250_v9  ;;  %v301_v1 = vmax.f32 %v942_v25, 1e-12  ;;  %vm371_vm3 = vcmp.eq.f32.partialorder %v896_v39, 0.0  ;;  %v372_v18 = vand.u32 2147483648, %v896_v39 }
  0xc6   :  { %559 = vrsqrt.f32 %v905_v22  ;;  %v548_v44 = vpop.eup %547  ;;  %v921_v4 = vpop.xlane.xlu1 %338  ;;  %v280_v29 = vsel %vm279_vm8, %v874_v36, %v278_v58  ;;  %v255_v51 = vsel %vm253_vm7, %v254_v47, %v252_v28  ;;  %vm362_vm4 = vcmp.eq.f32.partialorder %v905_v22, inf }
  0xc7   :  { %561 = vrsqrt.f32 %v921_v4  ;;  %v271_v16 = vmul.f32 %v548_v44, %v877_v41  ;;  %v956_v45 = vsel %vm281_vm9, %v282_v21, %v280_v29  ;;  %vm286_vm5 = vcmp.eq.f32.partialorder %v882_v49, inf }
  0xc8   :  { %v550_v0 = vpop.eup %549  ;;  %v299_v11 = vmax.f32 %v255_v51, 1e-12  ;;  %v303_v12 = vmax.f32 %v956_v45, 1e-12  ;;  %vm364_vm6 = vcmp.eq.f32.partialorder %v905_v22, 0.0  ;;  %v365_v27 = vand.u32 2147483648, %v905_v22 }
  0xc9   :  { %v937_v34 = vpop.xlane.xlu0 %335  ;;  %v273_v8 = vsel %vm272_vm10, %v877_v41, %v271_v16  ;;  %v292_v30 = vmul.f32 %v550_v0, %v880_v54  ;;  %vm383_vm7 = vcmp.eq.f32.partialorder %v921_v4, inf  ;;  %vm385_vm8 = vcmp.eq.f32.partialorder %v921_v4, 0.0 }
  0xca   :  { %563 = vrsqrt.f32 %v937_v34  ;;  %v950_v38 = vpop.xlane.xlu1 %344  ;;  %v987_v59 = vsel %vm274_vm11, %v275_v13, %v273_v8  ;;  %v386_v36 = vand.u32 2147483648, %v921_v4  ;;  %vm376_vm9 = vcmp.eq.f32.partialorder %v937_v34, inf }
  0xcb   :  { %565 = vrsqrt.f32 %v950_v38  ;;  %v294_v42 = vsel %vm293_vm13, %v880_v54, %v292_v30  ;;  %vm288_vm10 = vcmp.eq.f32.partialorder %v882_v49, 0.0  ;;  %vm378_vm11 = vcmp.eq.f32.partialorder %v937_v34, 0.0 }
  0xcc   :  { %v552_v48 = vpop.eup %551  ;;  %v379_v20 = vand.u32 2147483648, %v937_v34  ;;  %v302_v9 = vmax.f32 %v987_v59, 1e-12  ;;  %vm193_vm13 = vcmask 7168   ;;  %v400_v51 = vand.u32 2147483648, %v950_v38 }
  0xcd   :  { %v965_v19 = vpop.xlane.xlu0 %341  ;;  %v354_v31 = vmul.f32 %v552_v48, %v885_v60 }
  0xce   :  { %567 = vrsqrt.f32 %v965_v19  ;;  %v977_v50 = vpop.xlane.xlu1 %430 }
  0xcf   :  { %v554_v52 = vpop.eup %553  ;;  %v356_v46 = vsel %vm355_vm12, %v885_v60, %v354_v31  ;;  %vm397_vm12 = vcmp.eq.f32.partialorder %v950_v38, inf }
  0xd0   :  { %v556_v55 = vpop.eup %555  ;;  %v347_v63 = vmul.f32 %v554_v52, %v888_v56  ;;  %v359_v35 = vsel %vm357_vm14, %v358_v7, %v356_v46  ;;  %vm399_vm14 = vcmp.eq.f32.partialorder %v950_v38, 0.0 }
  0xd1   :  { %v558_v2 = vpop.eup %557  ;;  %v993_v33 = vpop.xlane.xlu0 %427  ;;  %v403_v43 = vmax.f32 %v359_v35, 1e-12  ;;  %v285_v62 = vmul.f32 %v556_v55, %v882_v49 }
  0xd2   :  { %v349_v41 = vsel %vm348_vm15, %v888_v56, %v347_v63  ;;  %v368_v60 = vmul.f32 %v558_v2, %v896_v39  ;;  %v1008_v32 = vpop.xlane.xlu1 %436  ;;  %v297_v56 = vsel %vm295_vm1, %v296_v5, %v294_v42  ;;  %vm390_vm15 = vcmp.eq.f32.partialorder %v965_v19, inf }
  0xd3   :  { %v560_v61 = vpop.eup %559  ;;  %v352_v53 = vsel %vm350_vm0, %v351_v26, %v349_v41  ;;  %v451_v40 = vmul.f32 %v403_v43, %v299_v11  ;;  %v287_v54 = vsel %vm286_vm5, %v882_v49, %v285_v62  ;;  %v305_v26 = vmax.f32 %v297_v56, 1e-12 }
  0xd4   :  { %v402_v57 = vmax.f32 %v352_v53, 1e-12  ;;  %v370_v10 = vsel %vm369_vm2, %v896_v39, %v368_v60  ;;  %v361_v37 = vmul.f32 %v560_v61, %v905_v22  ;;  %v562_v3 = vpop.eup %561  ;;  %vm392_vm0 = vcmp.eq.f32.partialorder %v965_v19, 0.0 }
  0xd5   :  { %v373_v47 = vsel %vm371_vm3, %v372_v18, %v370_v10  ;;  %v1022_v58 = vpop.xlane.xlu0 %433  ;;  %v382_v23 = vmul.f32 %v562_v3, %v921_v4  ;;  %569 = vrcp.f32 %v451_v40 }
  0xd6   :  { %v405_v21 = vmax.f32 %v373_v47, 1e-12  ;;  %v363_v44 = vsel %vm362_vm4, %v905_v22, %v361_v37  ;;  %v450_v5 = vmul.f32 %v402_v57, %v298_v15  ;;  %v1036_v28 = vpop.xlane.xlu1 %442 }
  0xd7   :  { %v564_v13 = vpop.eup %563  ;;  %v366_v39 = vsel %vm364_vm6, %v365_v27, %v363_v44  ;;  %v384_v25 = vsel %vm383_vm7, %v921_v4, %v382_v23  ;;  %v290_v4 = vsel %vm288_vm10, %v289_v14, %v287_v54 }
  0xd8   :  { %v404_v29 = vmax.f32 %v366_v39, 1e-12  ;;  %v375_v16 = vmul.f32 %v564_v13, %v937_v34  ;;  %v453_v0 = vmul.f32 %v405_v21, %v301_v1  ;;  %v566_v7 = vpop.eup %565  ;;  %v387_v22 = vsel %vm385_vm8, %v386_v36, %v384_v25 }
  0xd9   :  { %571 = vrcp.f32 %v450_v5  ;;  %v1045_v17 = vpop.xlane.xlu0 %439  ;;  %v407_v15 = vmax.f32 %v387_v22, 1e-12  ;;  %v396_v18 = vmul.f32 %v566_v7, %v950_v38  ;;  %v304_v59 = vmax.f32 %v290_v4, 1e-12 }
  0xda   :  { %v377_v48 = vsel %vm376_vm9, %v937_v34, %v375_v16  ;;  %573 = vrcp.f32 %v453_v0  ;;  %v452_v30 = vmul.f32 %v404_v29, %v300_v24  ;;  %v449_v31 = vpop.xlane.xlu1 %448  ;;  %v393_v34 = vand.u32 2147483648, %v965_v19 }
  0xdb   :  { %v568_v8 = vpop.eup %567  ;;  %v380_v1 = vsel %vm378_vm11, %v379_v20, %v377_v48  ;;  %v398_v11 = vsel %vm397_vm12, %v950_v38, %v396_v18  ;;  %v455_v49 = vmul.f32 %v407_v15, %v303_v12 }
  0xdc   :  { %v406_v52 = vmax.f32 %v380_v1, 1e-12  ;;  %v389_v27 = vmul.f32 %v568_v8, %v965_v19  ;;  %v401_v14 = vsel %vm399_vm14, %v400_v51, %v398_v11  ;;  %575 = vrcp.f32 %v452_v30 }
  0xdd   :  { %v446_v6 = vpop.xlane.xlu0 %445  ;;  %v409_v24 = vmax.f32 %v401_v14, 1e-12  ;;  %577 = vrcp.f32 %v455_v49 }
  0xde   :  { %v391_v55 = vsel %vm390_vm15, %v965_v19, %v389_v27  ;;  %v454_v46 = vmul.f32 %v406_v52, %v302_v9  ;;  %v174_v2 = vpop.xlane.xlu1 %173 }
  0xdf   :  { %v394_v63 = vsel %vm392_vm0, %v393_v34, %v391_v55  ;;  %v457_v45 = vmul.f32 %v409_v24, %v305_v26  ;;  %195 = vst.msk [vmem:[%s1144_s3 + $0x8] sm:$0xff] %vm193_vm13, %v174_v2 }
  0xe0   :  { %v408_v35 = vmax.f32 %v394_v63, 1e-12  ;;  %579 = vrcp.f32 %v454_v46 }
  0xe1   :  { %v171_v38 = vpop.xlane.xlu0 %170  ;;  %581 = vrcp.f32 %v457_v45 }
  0xe2   :  { %v456_v12 = vmul.f32 %v408_v35, %v304_v59  ;;  %194 = vst.msk [vmem:[%s1144_s3] sm:$0xff] %vm193_vm13, %v171_v38  ;;  %v570_v19 = vpop.eup %569  ;;  %v180_v36 = vpop.xlane.xlu1 %179 }
  0xe3   :  { %v461_v42 = vmul.f32 %v570_v19, %v977_v50  ;;  %197 = vst.msk [vmem:[%s1144_s3 + $0x18] sm:$0xff] %vm193_vm13, %v180_v36 }
  0xe4   :  { %583 = vrcp.f32 %v456_v12 }
  0xe5   :  { %v177_v43 = vpop.xlane.xlu0 %176  ;;  %v525_v60 = vclamps-f32 %v461_v42, 1.0 }
  0xe6   :  { %v572_v41 = vpop.eup %571  ;;  %196 = vst.msk [vmem:[%s1144_s3 + $0x10] sm:$0xff] %vm193_vm13, %v177_v43  ;;  %v186_v53 = vpop.xlane.xlu1 %185 }
  0xe7   :  { %v574_v61 = vpop.eup %573  ;;  %v459_v62 = vmul.f32 %v572_v41, %v993_v33  ;;  %491 = vst.msk [vmem:[%s1143_s2 + $0x8] sm:$0xff] %vm193_vm13, %v525_v60  ;;  %199 = vst.msk [vmem:[%s1144_s3 + $0x28] sm:$0xff] %vm193_vm13, %v186_v53 }
  0xe8   :  { %v465_v50 = vmul.f32 %v574_v61, %v1008_v32 }
  0xe9   :  { %v524_v20 = vclamps-f32 %v459_v62, 1.0  ;;  %v183_v57 = vpop.xlane.xlu0 %182  ;;  %v576_v10 = vpop.eup %575 }
  0xea   :  { %v527_v37 = vclamps-f32 %v465_v50, 1.0  ;;  %198 = vst.msk [vmem:[%s1144_s3 + $0x20] sm:$0xff] %vm193_vm13, %v183_v57  ;;  %v578_v33 = vpop.eup %577  ;;  %v463_v32 = vmul.f32 %v576_v10, %v1022_v58  ;;  %v192_v40 = vpop.xlane.xlu1 %191 }
  0xeb   :  { %490 = vst.msk [vmem:[%s1143_s2] sm:$0xff] %vm193_vm13, %v524_v20  ;;  %v469_v3 = vmul.f32 %v578_v33, %v1036_v28  ;;  %201 = vst.msk [vmem:[%s1144_s3 + $0x38] sm:$0xff] %vm193_vm13, %v192_v40 }
  0xec   :  { %493 = vst.msk [vmem:[%s1143_s2 + $0x18] sm:$0xff] %vm193_vm13, %v527_v37  ;;  %v526_v56 = vclamps-f32 %v463_v32, 1.0 }
  0xed   :  { %v580_v9 = vpop.eup %579  ;;  %v189_v47 = vpop.xlane.xlu0 %188  ;;  %v529_v21 = vclamps-f32 %v469_v3, 1.0 }
  0xee   :  { %v467_v44 = vmul.f32 %v580_v9, %v1045_v17  ;;  %200 = vst.msk [vmem:[%s1144_s3 + $0x30] sm:$0xff] %vm193_vm13, %v189_v47  ;;  %v582_v58 = vpop.eup %581  ;;  %492 = vst.msk [vmem:[%s1143_s2 + $0x10] sm:$0xff] %vm193_vm13, %v526_v56 }
  0xef   :  { %495 = vst.msk [vmem:[%s1143_s2 + $0x28] sm:$0xff] %vm193_vm13, %v529_v21  ;;  %v473_v13 = vmul.f32 %v582_v58, %v449_v31 }
  0xf0   :  { %v528_v23 = vclamps-f32 %v467_v44, 1.0 }
  0xf1   :  { %v584_v54 = vpop.eup %583  ;;  %v531_v39 = vclamps-f32 %v473_v13, 1.0 }
  0xf2   :  { %494 = vst.msk [vmem:[%s1143_s2 + $0x20] sm:$0xff] %vm193_vm13, %v528_v23  ;;  %v471_v5 = vmul.f32 %v584_v54, %v446_v6 }
  0xf3   :  { %497 = vst.msk [vmem:[%s1143_s2 + $0x38] sm:$0xff] %vm193_vm13, %v531_v39 }
  0xf4   :  { %v530_v28 = vclamps-f32 %v471_v5, 1.0 }
  0xf6   :  { %496 = vst.msk [vmem:[%s1143_s2 + $0x30] sm:$0xff] %vm193_vm13, %v530_v28 }
  0xf7   :  { %506 = vsyncpa [#allocation3], 1 }
  0xf8   :  { %507 = vsyncpa [#allocation5], 1 }

</bundles_post_ra>
